<compile_context>
chip_gen: v7x
topology: tpu7x:2x2x1
jax: 0.10.0
libtpu: 0.0.40
codegen_flags: <defaults>
</compile_context>

<pallas_src>
import jax
import jax.numpy as jnp
from jax import lax
from jax.experimental import pallas as pl
from jax.experimental.pallas import tpu as pltpu


class Config:
    INPUT_DIM = 32
    HIDDEN_DIM = 64


_EPS = 1e-8  # torch.cosine_similarity default eps


def _siamese_kernel(x1_ref, x2_ref, w_ref, b_ref, out_ref, feat1_ref):
    w = w_ref[...]
    b = b_ref[...]  # (1, N) f32

    # forward_once on each branch: two independent MXU dots (no concat/slice
    # VMEM copies). Accumulate in f32 regardless of operand dtype.
    feat1 = jnp.dot(x1_ref[...], w, preferred_element_type=jnp.float32) + b  # (TM, N)
    feat2 = jnp.dot(x2_ref[...], w, preferred_element_type=jnp.float32) + b  # (TM, N)

    # Cosine similarity along the feature axis (PyTorch dim=1); all f32 (v5e-safe).
    dot = jnp.sum(feat1 * feat2, axis=1, keepdims=True)   # (TM, 1)
    ss1 = jnp.sum(feat1 * feat1, axis=1, keepdims=True)
    ss2 = jnp.sum(feat2 * feat2, axis=1, keepdims=True)
    # dot / max(||f1||*||f2||, eps) == dot * rsqrt(max(ss1*ss2, eps^2))  (EUP rsqrt)
    sim = dot * lax.rsqrt(jnp.maximum(ss1 * ss2, _EPS * _EPS))            # (TM, 1)

    # out = stack([1 - sim, sim], dim=1) via an iota lane-select (VPU only, no
    # lane concat). The 2-lane store is masked but negligible in bytes.
    tm = out_ref.shape[0]
    cols = lax.broadcasted_iota(jnp.int32, (tm, 2), 1)
    out_ref[...] = jnp.where(cols == 1, sim, 1.0 - sim)
    feat1_ref[...] = feat1.astype(feat1_ref.dtype)


def _round_up(n, m):
    return ((n + m - 1) // m) * m


def base_classifier_forward(x1, x2, w, b, *, block_rows=None, mxu_dtype=None):
    """x1, x2: (B, INPUT_DIM); w: (INPUT_DIM, HIDDEN_DIM); b: (HIDDEN_DIM,).

    mxu_dtype: optional narrower dtype (e.g. jnp.bfloat16) for the MXU operands
    (x1/x2/w). Accumulation and all post-matmul math remain f32.
    """
    B, K = x1.shape
    N = w.shape[1]

    if mxu_dtype is not None:
        x1 = x1.astype(mxu_dtype)
        x2 = x2.astype(mxu_dtype)
        w = w.astype(mxu_dtype)
    b2d = b.reshape(1, N).astype(jnp.float32)

    if block_rows is None:
        # Big tiles to amortize per-step overhead; cap at half the batch
        # (rounded to 8 sublanes) so the parallel axis keeps >= 2 tiles for the
        # two v7x TensorCores. 4096 rows keeps double-buffered VMEM ~4 MiB.
        half = pl.cdiv(B, 2)
        block_rows = min(4096, max(8, _round_up(half, 8)))
    tm = block_rows
    n_tiles = pl.cdiv(B, tm)

    # No wrapper-side padding: the last tile may be ragged. Out-of-bounds input
    # rows are garbage but every reduction here is per-row, and out-of-bounds
    # output stores are masked by Pallas, so correctness is unaffected.
    out, feat1 = pl.pallas_call(
        _siamese_kernel,
        out_shape=(
            jax.ShapeDtypeStruct((B, 2), jnp.float32),
            jax.ShapeDtypeStruct((B, N), jnp.float32),
        ),
        grid=(n_tiles,),
        in_specs=[
            pl.BlockSpec((tm, K), lambda i: (i, 0)),   # x1 batch tile
            pl.BlockSpec((tm, K), lambda i: (i, 0)),   # x2 batch tile
            pl.BlockSpec((K, N), lambda i: (0, 0)),    # w: resident across grid
            pl.BlockSpec((1, N), lambda i: (0, 0)),    # b: resident across grid
        ],
        out_specs=(
            pl.BlockSpec((tm, 2), lambda i: (i, 0)),
            pl.BlockSpec((tm, N), lambda i: (i, 0)),
        ),
        compiler_params=pltpu.CompilerParams(
            dimension_semantics=("parallel",),          # shard batch tiles across TCs
            vmem_limit_bytes=32 * 1024 * 1024,          # safe on v7x (64 MiB part)
        ),
    )(x1, x2, w, b2d)

    return out, feat1


def _reference(x1, x2, w, b):
    feat1 = x1 @ w + b
    feat2 = x2 @ w + b
    dot = jnp.sum(feat1 * feat2, axis=1)
    n12 = jnp.maximum(
        jnp.linalg.norm(feat1, axis=1) * jnp.linalg.norm(feat2, axis=1), _EPS
    )
    sim = dot / n12
    return jnp.stack([1.0 - sim, sim], axis=1), feat1


if __name__ == "__main__":
    key = jax.random.PRNGKey(0)
    k1, k2, kw, kb = jax.random.split(key, 4)

    # Deterministic synthetic "forward_once" parameters.
    w = (
        jax.random.normal(kw, (Config.INPUT_DIM, Config.HIDDEN_DIM), dtype=jnp.float32)
        / jnp.sqrt(jnp.float32(Config.INPUT_DIM))
    )
    b = 0.01 * jax.random.normal(kb, (Config.HIDDEN_DIM,), dtype=jnp.float32)

    # Small pair batch (module-scale shapes), default f32 path: exact match.
    B = 8
    x1 = jax.random.normal(k1, (B, Config.INPUT_DIM), dtype=jnp.float32)
    x2 = jax.random.normal(k2, (B, Config.INPUT_DIM), dtype=jnp.float32)

    out, feat1 = base_classifier_forward(x1, x2, w, b)
    jax.block_until_ready((out, feat1))

    ref_out, ref_feat1 = _reference(x1, x2, w, b)
    assert out.shape == (B, 2) and feat1.shape == (B, Config.HIDDEN_DIM)
    assert jnp.allclose(out, ref_out, atol=1e-5, rtol=1e-5)
    assert jnp.allclose(feat1, ref_feat1, atol=1e-5, rtol=1e-5)

    # Multi-tile ragged path (no wrapper pad): B=40, 16-row tiles -> 3 steps,
    # last tile half out-of-bounds.
    B2 = 40
    x1b = jax.random.normal(jax.random.PRNGKey(1), (B2, Config.INPUT_DIM), jnp.float32)
    x2b = jax.random.normal(jax.random.PRNGKey(2), (B2, Config.INPUT_DIM), jnp.float32)
    out2, feat2_out = base_classifier_forward(x1b, x2b, w, b, block_rows=16)
    jax.block_until_ready((out2, feat2_out))
    ref_out2, ref_feat2 = _reference(x1b, x2b, w, b)
    assert out2.shape == (B2, 2) and feat2_out.shape == (B2, Config.HIDDEN_DIM)
    assert jnp.allclose(out2, ref_out2, atol=1e-5, rtol=1e-5)
    assert jnp.allclose(feat2_out, ref_feat2, atol=1e-5, rtol=1e-5)

    # Optional bf16-MXU path (halves x1/x2 HBM reads at large B); f32 accumulate,
    # looser tolerance against the f32 reference.
    out3, feat3 = base_classifier_forward(x1b, x2b, w, b, mxu_dtype=jnp.bfloat16)
    jax.block_until_ready((out3, feat3))
    assert jnp.allclose(out3, ref_out2, atol=5e-2, rtol=5e-2)
    assert jnp.allclose(feat3, ref_feat2, atol=1e-1, rtol=5e-2)

    print("KERNEL_OK")
</pallas_src>

<mosaic_0001>
module attributes {stable_mosaic.version = 11 : i64} {
  func.func @_siamese_kernel(%arg0: i32, %arg1: memref<8x32xf32, #tpu.memory_space<vmem>>, %arg2: memref<8x32xf32, #tpu.memory_space<vmem>>, %arg3: memref<32x64xf32, #tpu.memory_space<vmem>>, %arg4: memref<1x64xf32, #tpu.memory_space<vmem>>, %arg5: memref<8x2xf32, #tpu.memory_space<vmem>>, %arg6: memref<8x64xf32, #tpu.memory_space<vmem>>) attributes {dimension_semantics = [#tpu.dimension_semantics<parallel>], iteration_bounds = array<i64: 1>, scalar_prefetch = 0 : i64, scratch_operands = 0 : i64, tpu.core_type = #tpu.core_type<tc>, window_params = [{transform_indices = @transform_0, window_bounds = array<i64: 8, 32>}, {transform_indices = @transform_1, window_bounds = array<i64: 8, 32>}, {pipeline_mode = #tpu.pipeline_mode<synchronous>, transform_indices = @transform_2, window_bounds = array<i64: 32, 64>}, {pipeline_mode = #tpu.pipeline_mode<synchronous>, transform_indices = @transform_3, window_bounds = array<i64: 1, 64>}, {transform_indices = @transform_4, window_bounds = array<i64: 8, 2>}, {transform_indices = @transform_5, window_bounds = array<i64: 8, 64>}]} {
    %c0 = arith.constant 0 : index
    %c0_0 = arith.constant 0 : index
    %0 = vector.load %arg3[%c0, %c0_0] : memref<32x64xf32, #tpu.memory_space<vmem>>, vector<32x64xf32>
    %c0_1 = arith.constant 0 : index
    %c0_2 = arith.constant 0 : index
    %1 = vector.load %arg4[%c0_1, %c0_2] : memref<1x64xf32, #tpu.memory_space<vmem>>, vector<1x64xf32>
    %c0_3 = arith.constant 0 : index
    %c0_4 = arith.constant 0 : index
    %2 = vector.load %arg1[%c0_3, %c0_4] : memref<8x32xf32, #tpu.memory_space<vmem>>, vector<8x32xf32>
    %cst = arith.constant dense<0.000000e+00> : vector<8x64xf32>
    %3 = tpu.matmul %2, %0, %cst {dimension_numbers = #tpu.dot_dimension_numbers<[1], [0], [0], [1], [0, 0, 1, 1], [], []>} : vector<8x32xf32>, vector<32x64xf32>, vector<8x64xf32> -> vector<8x64xf32>
    %4 = vector.broadcast %1 : vector<1x64xf32> to vector<8x64xf32>
    %5 = arith.addf %3, %4 : vector<8x64xf32>
    %c0_5 = arith.constant 0 : index
    %c0_6 = arith.constant 0 : index
    %6 = vector.load %arg2[%c0_5, %c0_6] : memref<8x32xf32, #tpu.memory_space<vmem>>, vector<8x32xf32>
    %cst_7 = arith.constant dense<0.000000e+00> : vector<8x64xf32>
    %7 = tpu.matmul %6, %0, %cst_7 {dimension_numbers = #tpu.dot_dimension_numbers<[1], [0], [0], [1], [0, 0, 1, 1], [], []>} : vector<8x32xf32>, vector<32x64xf32>, vector<8x64xf32> -> vector<8x64xf32>
    %8 = vector.broadcast %1 : vector<1x64xf32> to vector<8x64xf32>
    %9 = arith.addf %7, %8 : vector<8x64xf32>
    %10 = arith.mulf %5, %9 : vector<8x64xf32>
    %cst_8 = arith.constant dense<0.000000e+00> : vector<8xf32>
    %11 = vector.multi_reduction <add>, %10, %cst_8 [1] : vector<8x64xf32> to vector<8xf32>
    %12 = vector.shape_cast %11 : vector<8xf32> to vector<8x1xf32>
    %13 = arith.mulf %5, %5 : vector<8x64xf32>
    %cst_9 = arith.constant dense<0.000000e+00> : vector<8xf32>
    %14 = vector.multi_reduction <add>, %13, %cst_9 [1] : vector<8x64xf32> to vector<8xf32>
    %15 = vector.shape_cast %14 : vector<8xf32> to vector<8x1xf32>
    %16 = arith.mulf %9, %9 : vector<8x64xf32>
    %cst_10 = arith.constant dense<0.000000e+00> : vector<8xf32>
    %17 = vector.multi_reduction <add>, %16, %cst_10 [1] : vector<8x64xf32> to vector<8xf32>
    %18 = vector.shape_cast %17 : vector<8xf32> to vector<8x1xf32>
    %19 = arith.mulf %15, %18 : vector<8x1xf32>
    %cst_11 = arith.constant 1.000000e-16 : f32
    %20 = vector.broadcast %cst_11 : f32 to vector<8x1xf32>
    %21 = arith.maximumf %19, %20 : vector<8x1xf32>
    %22 = math.rsqrt %21 : vector<8x1xf32>
    %23 = arith.mulf %12, %22 : vector<8x1xf32>
    %24 = tpu.iota {dimensions = array<i32: 1>} : vector<8x2xi32>
    %c1_i32 = arith.constant 1 : i32
    %25 = vector.broadcast %c1_i32 : i32 to vector<8x2xi32>
    %26 = arith.cmpi eq, %24, %25 : vector<8x2xi32>
    %cst_12 = arith.constant 1.000000e+00 : f32
    %27 = vector.broadcast %cst_12 : f32 to vector<8x1xf32>
    %28 = arith.subf %27, %23 : vector<8x1xf32>
    %29 = vector.shape_cast %23 : vector<8x1xf32> to vector<8x1xf32>
    %30 = vector.broadcast %29 : vector<8x1xf32> to vector<8x2xf32>
    %31 = vector.shape_cast %28 : vector<8x1xf32> to vector<8x1xf32>
    %32 = vector.broadcast %31 : vector<8x1xf32> to vector<8x2xf32>
    %33 = arith.select %26, %30, %32 : vector<8x2xi1>, vector<8x2xf32>
    %c0_13 = arith.constant 0 : index
    %c0_14 = arith.constant 0 : index
    %34 = vector.load %arg5[%c0_13, %c0_14] : memref<8x2xf32, #tpu.memory_space<vmem>>, vector<8x2xf32>
    tpu.vector_store %arg5[%c0_13, %c0_14], %33 {strides = array<i32>} : memref<8x2xf32, #tpu.memory_space<vmem>>, vector<8x2xf32>,
    %c0_15 = arith.constant 0 : index
    %c0_16 = arith.constant 0 : index
    %35 = vector.load %arg6[%c0_15, %c0_16] : memref<8x64xf32, #tpu.memory_space<vmem>>, vector<8x64xf32>
    tpu.vector_store %arg6[%c0_15, %c0_16], %5 {strides = array<i32>} : memref<8x64xf32, #tpu.memory_space<vmem>>, vector<8x64xf32>,
    return
  }
  func.func @transform_0(%arg0: i32) -> (i32, i32) {
    %c0_i32 = arith.constant 0 : i32
    %c0_i32_0 = arith.constant 0 : i32
    return %arg0, %c0_i32 : i32, i32
  }
  func.func @transform_1(%arg0: i32) -> (i32, i32) {
    %c0_i32 = arith.constant 0 : i32
    %c0_i32_0 = arith.constant 0 : i32
    return %arg0, %c0_i32 : i32, i32
  }
  func.func @transform_2(%arg0: i32) -> (i32, i32) {
    %c0_i32 = arith.constant 0 : i32
    %c0_i32_0 = arith.constant 0 : i32
    %c0_i32_1 = arith.constant 0 : i32
    return %c0_i32, %c0_i32_0 : i32, i32
  }
  func.func @transform_3(%arg0: i32) -> (i32, i32) {
    %c0_i32 = arith.constant 0 : i32
    %c0_i32_0 = arith.constant 0 : i32
    %c0_i32_1 = arith.constant 0 : i32
    return %c0_i32, %c0_i32_0 : i32, i32
  }
  func.func @transform_4(%arg0: i32) -> (i32, i32) {
    %c0_i32 = arith.constant 0 : i32
    %c0_i32_0 = arith.constant 0 : i32
    return %arg0, %c0_i32 : i32, i32
  }
  func.func @transform_5(%arg0: i32) -> (i32, i32) {
    %c0_i32 = arith.constant 0 : i32
    %c0_i32_0 = arith.constant 0 : i32
    return %arg0, %c0_i32 : i32, i32
  }
}

</mosaic_0001>

<bundles_post_ra>
// kernel: tpu_custom_call.1
= control target key start
LH: loop header
LB: loop body
LE: loop exit
PB: predicated region body
PF: predicated region fallthrough
CT: control target
= control target key end

     0   :  { %11 = vsyncpa [#allocation3], 0  ;;  %s507_s0 = inlined_call_operand.hbm [shape: f32[8,32], index: 0, kind: input, shape index: {}]   ;;  %s508_s1 = inlined_call_operand.hbm [shape: f32[8,32], index: 1, kind: input, shape index: {}]   ;;  %s509_s2 = inlined_call_operand.hbm [shape: f32[32,64], index: 2, kind: input, shape index: {}]   ;;  %s510_s3 = inlined_call_operand.vmem [shape: f32[1,64], index: 3, kind: input, shape index: {}]   ;;  %s511_s4 = inlined_call_operand.vmem [shape: f32[8,2], index: 4, kind: output, shape index: {0}]   ;;  %s512_s5 = inlined_call_operand.hbm [shape: f32[8,64], index: 5, kind: output, shape index: {1}]  }
   0x1   :  { %12 = vsyncpa [#allocation6], 0 }
   0x2   :  { %13 = vsyncpa [#allocation4], 0  ;;  %s414_s18 = smov [#allocation5]   ;;  %s415_s20 = smov [#allocation2]  }
   0x3   :  { %s30_s19 = sshll.u32 %s414_s18, 4  ;;  %s20_s21 = sshll.u32 %s415_s20, 4  ;;  %s31_s19 = int_to_ptr.vmem [resolvable:$true] %s30_s19  ;;  %s21_s21 = int_to_ptr.vmem [resolvable:$true] %s20_s21 }
   0x4   :  { %s320_s24 = scalar_lea.hbm %s508_s1, 128 }
   0x5   :  { %p321_p0 = scmp.ne.s32.totalorder %s508_s1, %s320_s24  ;;  %p324_p1 = scmp.lt.u32.totalorder %s320_s24, %s508_s1 }
   0x7   :  { %p326_p2 = pnand %p324_p1, %p321_p0 }
   0x9   :  { %329 = shalt.err (!%p326_p2)
}
   0xa   :  { %s330_s29 = scalar_lea.vmem %s31_s19, 128  ;;  %p335_p4 = scmp.lt.s32.totalorder %s31_s19, %s31_s19 }
   0xb   :  { %p331_p3 = scmp.ne.s32.totalorder %s31_s19, %s330_s29  ;;  %p336_p5 = scmp.lt.s32.totalorder %s330_s29, %s330_s29 }
   0xd   :  { %p337_p6 = por %p336_p5, %p335_p4 }
   0xf   :  { %p338_p7 = pnand %p337_p6, %p331_p3 }
  0x11   :  { %341 = shalt.err (!%p338_p7)
}
  0x12   :  { %33 = dma.hbm_to_vmem [thread:$0]  %s508_s1, 128, %s31_s19, [#allocation6]  }
  0x13   :  { %s342_s9 = scalar_lea.hbm %s507_s0, 128 }
  0x14   :  { %p343_p8 = scmp.ne.s32.totalorder %s507_s0, %s342_s9  ;;  %p346_p9 = scmp.lt.u32.totalorder %s342_s9, %s507_s0 }
  0x16   :  { %p348_p10 = pnand %p346_p9, %p343_p8 }
  0x18   :  { %351 = shalt.err (!%p348_p10)
}
  0x19   :  { %s352_s14 = scalar_lea.vmem %s21_s21, 128  ;;  %p357_p12 = scmp.lt.s32.totalorder %s21_s21, %s21_s21 }
  0x1a   :  { %p353_p11 = scmp.ne.s32.totalorder %s21_s21, %s352_s14  ;;  %p358_p13 = scmp.lt.s32.totalorder %s352_s14, %s352_s14 }
  0x1c   :  { %p359_p0 = por %p358_p13, %p357_p12 }
  0x1e   :  { %p360_p1 = pnand %p359_p0, %p353_p11 }
  0x20   :  { %363 = shalt.err (!%p360_p1)
}
  0x21   :  { %23 = dma.hbm_to_vmem [thread:$0]  %s507_s0, 128, %s21_s21, [#allocation3]  }
  0x22   :  { %s416_s16 = smov [#allocation7]   ;;  %s364_s20 = scalar_lea.hbm %s509_s2, 512 }
  0x23   :  { %s39_s17 = sshll.u32 %s416_s16, 4  ;;  %p365_p2 = scmp.ne.s32.totalorder %s509_s2, %s364_s20  ;;  %s40_s17 = int_to_ptr.vmem [resolvable:$true] %s39_s17 }
  0x24   :  { %p368_p3 = scmp.lt.u32.totalorder %s364_s20, %s509_s2 }
  0x26   :  { %p370_p4 = pnand %p368_p3, %p365_p2 }
  0x28   :  { %373 = shalt.err (!%p370_p4)
}
  0x29   :  { %s374_s26 = scalar_lea.vmem %s40_s17, 512  ;;  %p379_p6 = scmp.lt.s32.totalorder %s40_s17, %s40_s17 }
  0x2a   :  { %p375_p5 = scmp.ne.s32.totalorder %s40_s17, %s374_s26  ;;  %p380_p7 = scmp.lt.s32.totalorder %s374_s26, %s374_s26 }
  0x2c   :  { %p381_p8 = por %p380_p7, %p379_p6 }
  0x2e   :  { %p382_p9 = pnand %p381_p8, %p375_p5 }
  0x30   :  { %385 = shalt.err (!%p382_p9)
}
  0x31   :  { %s417_s0 = smov 128   ;;  %s418_s21 = smov 8  }
  0x32   :  { %45 = dma.hbm_to_vmem [thread:$0]  %s509_s2, 512, %s40_s17, [#allocation6], %s417_s0, %s417_s0, %s418_s21  }
  0x33   :  { %408 = dma.done.wait [#allocation3], 128  }
  0x34   :  { %409 = vsyncadd [#allocation3], 4294967168 }
  0x35   :  { %410 = dma.done.wait [#allocation6], 640  }
  0x36   :  { %411 = vsyncadd [#allocation6], 4294966656  ;;  %v419_v0 = vmov 0.0|0.0   ;;  %vm420_vm0 = vmmov 0   ;;  %v421_v1 = vmov 0.0   ;;  %v57_v2 = vld [vmem:[#allocation7] sm:$0xff] }
  0x37   :  { %297 = vmatprep.subr.bf16.mxu0 %v419_v0  ;;  %303 = vmatprep.subr.bf16.mxu1 %v419_v0  ;;  %v58_v3 = vld [vmem:[#allocation7 + $0x8] sm:$0xff]  ;;  %v59_v4 = vld [vmem:[#allocation7 + $0x10] sm:$0xff]  ;;  %v60_v6 = vld [vmem:[#allocation7 + $0x18] sm:$0xff]  ;;  %vm69_vm1 = vcmask 261120   ;;  %vm218_vm2 = vcmask 523264   ;;  %s422_s30 = smov [#allocation8]  }
  0x38   :  { %283 = vmatprep.mubr.msk.f32.mxu0 %vm420_vm0, %v421_v1  ;;  %294 = vmatprep.mubr.msk.f32.mxu1 %vm420_vm0, %v421_v1  ;;  %v298_v5 = vpack.c.bf16 %v58_v3, %v57_v2  ;;  %v301_v7 = vpack.c.bf16 %v60_v6, %v59_v4  ;;  %v62_v8 = vld [vmem:[#allocation2] sm:$0xff]  ;;  %v143_v9 = vld [vmem:[#allocation5] sm:$0xff]  ;;  %s250_s6 = sshll.u32 %s422_s30, 4  ;;  %s251_s6 = int_to_ptr.vmem [resolvable:$true] %s250_s6 }
  0x39   :  { %v262_v10 = vld [vmem:[%s510_s3] ss:$0 sm:$0xff]  ;;  %s386_s3 = scalar_lea.vmem %s251_s6, 128  ;;  %p391_p11 = scmp.lt.s32.totalorder %s251_s6, %s251_s6 }
  0x3a   :  { %299 = vmatpush3.bf16.msra.mxu0 %v298_v5  ;;  %305 = vmatpush3.bf16.msra.mxu1 %v298_v5  ;;  %p387_p10 = scmp.ne.s32.totalorder %s251_s6, %s386_s3  ;;  %p392_p12 = scmp.lt.s32.totalorder %s386_s3, %s386_s3 }
  0x3b   :  { %300 = vmatprep.subr.bf16.mxu0 %v419_v0  ;;  %306 = vmatprep.subr.bf16.mxu1 %v419_v0 }
  0x3c   :  { %p393_p13 = por %p392_p12, %p391_p11 }
  0x3e   :  { %302 = vmatpush3.bf16.msra.mxu0 %v301_v7  ;;  %308 = vmatpush3.bf16.msra.mxu1 %v301_v7  ;;  %p394_p0 = pnand %p393_p13, %p387_p10 }
  0x41   :  { %284 = vmatmul.mubr.msk.f32.vlgmr.msra.gmra.mrb[0].mxu0 %vm69_vm1, %v62_v8  ;;  %295 = vmatmul.mubr.msk.f32.vlgmr.msra.gmra.mrb[0].mxu1 %vm69_vm1, %v143_v9 }
 0x114   :  { %v139_v11 = vpop.f32.mrb[0].mxu0  ;;  %v213_v12 = vpop.f32.mrb[0].mxu1 }
 0x115   :  { %v140_v13 = vadd.f32 %v262_v10, %v139_v11  ;;  %v214_v14 = vadd.f32 %v262_v10, %v213_v12  ;;  %v285_v15 = vpop.f32.mrb[1].mxu0  ;;  %v296_v16 = vpop.f32.mrb[1].mxu1 }
 0x117   :  { %v222_v17 = vmul.f32 %v140_v13, %v140_v13  ;;  %241 = vst.msk [vmem:[#allocation8] sm:$0xff] %vm218_vm2, %v140_v13  ;;  %v217_v18 = vmul.f32 %v214_v14, %v140_v13  ;;  %v226_v19 = vmul.f32 %v214_v14, %v214_v14 }
 0x119   :  { %v223_v20 = vsel %vm218_vm2, %v222_v17, 0.0  ;;  %v219_v21 = vsel %vm218_vm2, %v217_v18, 0.0  ;;  %v227_v22 = vsel %vm218_vm2, %v226_v19, 0.0 }
 0x11a   :  { %224 = vadd.xlane.f32.xlu0 %v223_v20  ;;  %220 = vadd.xlane.f32.xlu1 %v219_v21 }
 0x11e   :  { %228 = vadd.xlane.f32.xlu0 %v227_v22 }
 0x11f   :  { %397 = shalt.err (!%p394_p0)
}
 0x120   :  { %s398_s9 = scalar_lea.hbm %s512_s5, 128 }
 0x121   :  { %p399_p1 = scmp.ne.s32.totalorder %s512_s5, %s398_s9  ;;  %p402_p2 = scmp.lt.u32.totalorder %s398_s9, %s512_s5 }
 0x123   :  { %p404_p3 = pnand %p402_p2, %p399_p1 }
 0x125   :  { %407 = shalt.err (!%p404_p3)
}
 0x126   :  { %253 = dma.vmem_to_hbm [thread:$0]  %s251_s6, 128, %s512_s5, [#allocation4]   ;;  %v234_v27 = vlaneseq  ;;  %vm239_vm4 = vcmask 15360  }
 0x128   :  { %v235_v28 = vand.u32 127, %v234_v27 }
 0x12a   :  { %vm236_vm3 = vcmp.eq.s32.totalorder %v235_v28, 1 }
 0x1a7   :  { %v225_v23 = vpop.xlane.xlu0 %224  ;;  %v221_v30 = vpop.xlane.xlu1 %220 }
 0x1ab   :  { %v229_v24 = vpop.xlane.xlu0 %228 }
 0x1ac   :  { %v230_v25 = vmul.f32 %v229_v24, %v225_v23 }
 0x1ae   :  { %v231_v26 = vmax.f32 %v230_v25, 1e-16 }
 0x1b0   :  { %318 = vrsqrt.f32 %v231_v26 }
 0x1ba   :  { %v319_v29 = vpop.eup %318 }
 0x1bb   :  { %v233_v31 = vmul.f32 %v319_v29, %v221_v30 }
 0x1bd   :  { %v237_v32 = vsub.f32 1.0, %v233_v31 }
 0x1bf   :  { %v238_v33 = vsel %vm236_vm3, %v233_v31, %v237_v32 }
 0x1c0   :  { %240 = vst.msk [vmem:[%s511_s4] sm:$0xff] %vm239_vm4, %v238_v33 }
 0x1c1   :  { %412 = dma.done.wait [#allocation4], 128  }
 0x1c2   :  { %413 = vsyncadd [#allocation4], 4294967168 }
 0x1c3   :  { %259 = vsyncpa [#allocation3], 1 }
 0x1c4   :  { %260 = vsyncpa [#allocation6], 1 }
 0x1c5   :  { %261 = vsyncpa [#allocation4], 1 }

</bundles_post_ra>
